<compile_context>
chip_gen: v7x
topology: tpu7x:2x2x1
jax: 0.10.0
libtpu: 0.0.40
codegen_flags: <defaults>
</compile_context>

<pallas_src>
import jax
import jax.numpy as jnp
from jax.experimental import pallas as pl
from jax.experimental.pallas import tpu as pltpu


# --------------------- weight preprocessing (build time) --------------------

def _conv1d_as_dense(w, l_in, stride, padding):
    """Unroll Conv1d weights (Cout, Cin, K) into a dense matrix mapping the
    channel-major flattened input (Cin*L_in,) to the channel-major flattened
    output (Cout*L_out,):  out_flat = in_flat @ dense.
    Runs once at model construction -- never on the activation path."""
    cout, cin, k = w.shape
    l_out = (l_in + 2 * padding - k) // stride + 1
    li = jnp.arange(l_in)
    lo = jnp.arange(l_out)
    ki = li[:, None] - stride * lo[None, :] + padding            # (L_in, L_out)
    valid = (ki >= 0) & (ki < k)
    wk = jnp.take(w, jnp.clip(ki, 0, k - 1), axis=2)             # (Cout,Cin,L_in,L_out)
    wk = jnp.where(valid[None, None, :, :], wk, 0.0)
    dense = wk.transpose(1, 2, 0, 3).reshape(cin * l_in, cout * l_out)
    return dense, l_out


# ------------------------------ fused kernel --------------------------------

def _make_fused_kernel(op_types, compute_dtype):
    """Build the fused forward kernel.  Refs: (x, *params, out).
    op_types: tuple of 'conv' (consumes W, bias_row) / 'skip' (consumes W)."""

    def kernel(*refs):
        x_ref, o_ref = refs[0], refs[-1]
        params = refs[1:-1]
        h = x_ref[...]                    # (TB, C0*L0) f32, VMEM resident
        x_copy = h
        p = 0
        for t in op_types:                # statically unrolled at trace time
            if t == 'conv':
                w_ref, b_ref = params[p], params[p + 1]
                p += 2
                acc = jnp.dot(h.astype(compute_dtype),
                              w_ref[...].astype(compute_dtype),
                              preferred_element_type=jnp.float32)
                h = jnp.maximum(acc + b_ref[...], 0.0)   # fused bias + ReLU (VPU)
            else:  # 'skip': bias-free conv on x_copy, fused residual add
                w_ref = params[p]
                p += 1
                acc = jnp.dot(x_copy.astype(compute_dtype),
                              w_ref[...].astype(compute_dtype),
                              preferred_element_type=jnp.float32)
                h = h + acc
                x_copy = h
        o_ref[...] = h.astype(o_ref.dtype)

    return kernel


# ------------------------------- the model ----------------------------------

class ConvNetPallas:
    def __init__(self, input_dims, in_channel, filters, kernels, strides,
                 skip_by, dropout, key, compute_dtype=jnp.float32):
        err = 'input length is not equal ({0}, {1})'
        assert len(filters) == len(kernels), err.format('filters', 'kernels')
        assert len(filters) == len(strides), err.format('filters', 'strides')
        assert len(kernels) == len(strides), err.format('kernels', 'strides')

        # compute_dtype=jnp.bfloat16 doubles MXU throughput at production
        # shapes (accumulation stays f32); default f32 for exact parity.
        self.compute_dtype = compute_dtype
        self.dropout = dropout            # TODO(synk): identity at inference.
        self.input_dims = int(input_dims)
        self.in_channel = int(in_channel)

        in_ch = in_channel
        skip_in_ch = in_ch
        acc_stride = 1
        dims_counts = int(input_dims)     # reference bookkeeping formula
        skip_output_dims = int(input_dims)
        skip_kernel_size = None

        dims = int(input_dims)            # actual running length
        copy_dims = int(input_dims)       # length of x_copy

        keys = jax.random.split(key, 3 * len(filters))
        self.op_types = []                # 'conv' / 'skip' execution order
        self.params = []                  # flattened param arrays, same order
        self.raw_layers = []              # raw conv weights for self-check

        for idx, (out_ch, kernel, stride) in enumerate(zip(filters, kernels, strides)):
            wk, bk, sk = keys[3 * idx], keys[3 * idx + 1], keys[3 * idx + 2]
            w = 0.1 * jax.random.normal(wk, (out_ch, in_ch, kernel), jnp.float32)
            b = 0.01 * jax.random.normal(bk, (out_ch,), jnp.float32)
            pad = (kernel - 1) // 2
            w_dense, l_out = _conv1d_as_dense(w, dims, stride, pad)
            b_row = jnp.repeat(b, l_out).reshape(1, out_ch * l_out)
            self.op_types.append('conv')
            self.params += [w_dense, b_row]
            raw = {'w': w, 'b': b, 'stride': stride, 'skip': None}

            in_ch = out_ch
            acc_stride *= stride
            dims = l_out
            dims_counts = (dims_counts - 1) // stride + 1
            if idx % skip_by:
                skip_kernel_size = kernel
            if idx % skip_by == (-1) % skip_by:
                if skip_kernel_size is None:       # guard for skip_by == 1
                    skip_kernel_size = kernel
                sw = 0.1 * jax.random.normal(
                    sk, (out_ch, skip_in_ch, skip_kernel_size), jnp.float32)
                spad = (skip_kernel_size - 1) // 2
                sw_dense, s_l_out = _conv1d_as_dense(sw, copy_dims, acc_stride, spad)
                assert s_l_out == dims, 'skip path length mismatch (even kernel?)'
                self.op_types.append('skip')
                self.params.append(sw_dense)
                raw['skip'] = {'w': sw, 'stride': acc_stride}
                skip_output_dims = (skip_output_dims - 1) // acc_stride + 1
                acc_stride = 1
                skip_in_ch = out_ch
                copy_dims = dims
            self.raw_layers.append(raw)

        self.op_types = tuple(self.op_types)
        self.skip_by = skip_by
        self.outputChannels = out_ch
        self.outputDims = dims_counts              # reference formula (== dims for odd k)
        self.outputSize = out_ch * dims_counts
        self.skip_outputDims = skip_output_dims
        self._flat_out = out_ch * dims             # actual kernel output width
        self._kernel = _make_fused_kernel(self.op_types, self.compute_dtype)

    @staticmethod
    def _batch_tile(n):
        # Rows per grid step: full batch if tiny, else a multiple of 8 capped
        # so double-buffered tiles comfortably fit v7x's 64 MiB VMEM.
        if n <= 8:
            return n
        return min(256, -(-n // 8) * 8)

    def __call__(self, x):
        n = x.shape[0]
        # NCL -> channel-major flat layout (C*L, L fastest) == nn.Flatten layout.
        x_flat = x.reshape(n, -1).astype(jnp.float32)
        f_in = x_flat.shape[1]
        f_out = self._flat_out

        tb = self._batch_tile(n)
        n_pad = -(-n // tb) * tb
        if n_pad != n:
            x_flat = jnp.pad(x_flat, ((0, n_pad - n), (0, 0)))
        grid = (n_pad // tb,)

        in_specs = [pl.BlockSpec((tb, f_in), lambda i: (i, 0))]
        in_specs += [pl.BlockSpec(p.shape, lambda i: (0, 0)) for p in self.params]
        out_specs = pl.BlockSpec((tb, f_out), lambda i: (i, 0))

        out = pl.pallas_call(
            self._kernel,
            out_shape=jax.ShapeDtypeStruct((n_pad, f_out), jnp.float32),
            grid=grid,
            in_specs=in_specs,
            out_specs=out_specs,
            compiler_params=pltpu.CompilerParams(
                dimension_semantics=("parallel",),   # megacore / v7x 2-TC sharding
                vmem_limit_bytes=32 * 1024 * 1024),
        )(x_flat, *self.params)
        return out[:n]

    # Pure-JAX reference (XLA conv) used only for the correctness self-check.
    def reference(self, x):
        def conv1d(a, w, stride):
            k = w.shape[-1]
            p = (k - 1) // 2
            return jax.lax.conv_general_dilated(
                a, w, window_strides=(stride,), padding=[(p, p)],
                dimension_numbers=('NCH', 'OIH', 'NCH'))
        x_copy = x
        for layer in self.raw_layers:
            x = jnp.maximum(conv1d(x, layer['w'], layer['stride'])
                            + layer['b'][None, :, None], 0.0)
            if layer['skip'] is not None:
                x = x + conv1d(x_copy, layer['skip']['w'], layer['skip']['stride'])
                x_copy = x
        return x.reshape(x.shape[0], -1)


# ---------------------------------- main -------------------------------------

if __name__ == "__main__":
    key = jax.random.PRNGKey(0)
    k_model, k_x = jax.random.split(key)

    input_dims = 16
    in_channel = 4
    filters = [8, 8, 16, 16]
    kernels = [3, 3, 3, 3]
    strides = [1, 2, 1, 2]
    skip_by = 2
    dropout = 0.0

    model = ConvNetPallas(input_dims, in_channel, filters, kernels, strides,
                          skip_by, dropout, key=k_model)

    x = jax.random.normal(k_x, (2, in_channel, input_dims), jnp.float32)
    out = jax.block_until_ready(model(x))

    assert out.shape == (2, model.outputSize), out.shape       # (2, 16*4) = (2, 64)
    assert bool(jnp.all(jnp.isfinite(out)))

    # Numerical self-check against XLA convolutions.
    ref = jax.block_until_ready(model.reference(x))
    assert jnp.allclose(out, ref, rtol=2e-3, atol=2e-3), \
        float(jnp.max(jnp.abs(out - ref)))

    print("KERNEL_OK")
</pallas_src>

<mosaic_0001>
module attributes {stable_mosaic.version = 11 : i64} {
  func.func @kernel(%arg0: i32, %arg1: memref<2x64xf32, #tpu.memory_space<vmem>>, %arg2: memref<64x128xf32, #tpu.memory_space<vmem>>, %arg3: memref<1x128xf32, #tpu.memory_space<vmem>>, %arg4: memref<128x64xf32, #tpu.memory_space<vmem>>, %arg5: memref<1x64xf32, #tpu.memory_space<vmem>>, %arg6: memref<64x64xf32, #tpu.memory_space<vmem>>, %arg7: memref<64x128xf32, #tpu.memory_space<vmem>>, %arg8: memref<1x128xf32, #tpu.memory_space<vmem>>, %arg9: memref<128x64xf32, #tpu.memory_space<vmem>>, %arg10: memref<1x64xf32, #tpu.memory_space<vmem>>, %arg11: memref<64x64xf32, #tpu.memory_space<vmem>>, %arg12: memref<2x64xf32, #tpu.memory_space<vmem>>) attributes {dimension_semantics = [#tpu.dimension_semantics<parallel>], iteration_bounds = array<i64: 1>, scalar_prefetch = 0 : i64, scratch_operands = 0 : i64, tpu.core_type = #tpu.core_type<tc>, window_params = [{transform_indices = @transform_0, window_bounds = array<i64: 2, 64>}, {pipeline_mode = #tpu.pipeline_mode<synchronous>, transform_indices = @transform_1, window_bounds = array<i64: 64, 128>}, {pipeline_mode = #tpu.pipeline_mode<synchronous>, transform_indices = @transform_2, window_bounds = array<i64: 1, 128>}, {pipeline_mode = #tpu.pipeline_mode<synchronous>, transform_indices = @transform_3, window_bounds = array<i64: 128, 64>}, {pipeline_mode = #tpu.pipeline_mode<synchronous>, transform_indices = @transform_4, window_bounds = array<i64: 1, 64>}, {pipeline_mode = #tpu.pipeline_mode<synchronous>, transform_indices = @transform_5, window_bounds = array<i64: 64, 64>}, {pipeline_mode = #tpu.pipeline_mode<synchronous>, transform_indices = @transform_6, window_bounds = array<i64: 64, 128>}, {pipeline_mode = #tpu.pipeline_mode<synchronous>, transform_indices = @transform_7, window_bounds = array<i64: 1, 128>}, {pipeline_mode = #tpu.pipeline_mode<synchronous>, transform_indices = @transform_8, window_bounds = array<i64: 128, 64>}, {pipeline_mode = #tpu.pipeline_mode<synchronous>, transform_indices = @transform_9, window_bounds = array<i64: 1, 64>}, {pipeline_mode = #tpu.pipeline_mode<synchronous>, transform_indices = @transform_10, window_bounds = array<i64: 64, 64>}, {transform_indices = @transform_11, window_bounds = array<i64: 2, 64>}]} {
    %c0 = arith.constant 0 : index
    %c0_0 = arith.constant 0 : index
    %0 = vector.load %arg1[%c0, %c0_0] : memref<2x64xf32, #tpu.memory_space<vmem>>, vector<2x64xf32>
    %c0_1 = arith.constant 0 : index
    %c0_2 = arith.constant 0 : index
    %1 = vector.load %arg2[%c0_1, %c0_2] : memref<64x128xf32, #tpu.memory_space<vmem>>, vector<64x128xf32>
    %cst = arith.constant dense<0.000000e+00> : vector<2x128xf32>
    %2 = tpu.matmul %0, %1, %cst {dimension_numbers = #tpu.dot_dimension_numbers<[1], [0], [0], [1], [0, 0, 1, 1], [], []>} : vector<2x64xf32>, vector<64x128xf32>, vector<2x128xf32> -> vector<2x128xf32>
    %c0_3 = arith.constant 0 : index
    %c0_4 = arith.constant 0 : index
    %3 = vector.load %arg3[%c0_3, %c0_4] : memref<1x128xf32, #tpu.memory_space<vmem>>, vector<1x128xf32>
    %4 = vector.broadcast %3 : vector<1x128xf32> to vector<2x128xf32>
    %5 = arith.addf %2, %4 : vector<2x128xf32>
    %cst_5 = arith.constant 0.000000e+00 : f32
    %6 = vector.broadcast %cst_5 : f32 to vector<2x128xf32>
    %7 = arith.maximumf %5, %6 : vector<2x128xf32>
    %c0_6 = arith.constant 0 : index
    %c0_7 = arith.constant 0 : index
    %8 = vector.load %arg4[%c0_6, %c0_7] : memref<128x64xf32, #tpu.memory_space<vmem>>, vector<128x64xf32>
    %cst_8 = arith.constant dense<0.000000e+00> : vector<2x64xf32>
    %9 = tpu.matmul %7, %8, %cst_8 {dimension_numbers = #tpu.dot_dimension_numbers<[1], [0], [0], [1], [0, 0, 1, 1], [], []>} : vector<2x128xf32>, vector<128x64xf32>, vector<2x64xf32> -> vector<2x64xf32>
    %c0_9 = arith.constant 0 : index
    %c0_10 = arith.constant 0 : index
    %10 = vector.load %arg5[%c0_9, %c0_10] : memref<1x64xf32, #tpu.memory_space<vmem>>, vector<1x64xf32>
    %11 = vector.broadcast %10 : vector<1x64xf32> to vector<2x64xf32>
    %12 = arith.addf %9, %11 : vector<2x64xf32>
    %cst_11 = arith.constant 0.000000e+00 : f32
    %13 = vector.broadcast %cst_11 : f32 to vector<2x64xf32>
    %14 = arith.maximumf %12, %13 : vector<2x64xf32>
    %c0_12 = arith.constant 0 : index
    %c0_13 = arith.constant 0 : index
    %15 = vector.load %arg6[%c0_12, %c0_13] : memref<64x64xf32, #tpu.memory_space<vmem>>, vector<64x64xf32>
    %cst_14 = arith.constant dense<0.000000e+00> : vector<2x64xf32>
    %16 = tpu.matmul %0, %15, %cst_14 {dimension_numbers = #tpu.dot_dimension_numbers<[1], [0], [0], [1], [0, 0, 1, 1], [], []>} : vector<2x64xf32>, vector<64x64xf32>, vector<2x64xf32> -> vector<2x64xf32>
    %17 = arith.addf %14, %16 : vector<2x64xf32>
    %c0_15 = arith.constant 0 : index
    %c0_16 = arith.constant 0 : index
    %18 = vector.load %arg7[%c0_15, %c0_16] : memref<64x128xf32, #tpu.memory_space<vmem>>, vector<64x128xf32>
    %cst_17 = arith.constant dense<0.000000e+00> : vector<2x128xf32>
    %19 = tpu.matmul %17, %18, %cst_17 {dimension_numbers = #tpu.dot_dimension_numbers<[1], [0], [0], [1], [0, 0, 1, 1], [], []>} : vector<2x64xf32>, vector<64x128xf32>, vector<2x128xf32> -> vector<2x128xf32>
    %c0_18 = arith.constant 0 : index
    %c0_19 = arith.constant 0 : index
    %20 = vector.load %arg8[%c0_18, %c0_19] : memref<1x128xf32, #tpu.memory_space<vmem>>, vector<1x128xf32>
    %21 = vector.broadcast %20 : vector<1x128xf32> to vector<2x128xf32>
    %22 = arith.addf %19, %21 : vector<2x128xf32>
    %cst_20 = arith.constant 0.000000e+00 : f32
    %23 = vector.broadcast %cst_20 : f32 to vector<2x128xf32>
    %24 = arith.maximumf %22, %23 : vector<2x128xf32>
    %c0_21 = arith.constant 0 : index
    %c0_22 = arith.constant 0 : index
    %25 = vector.load %arg9[%c0_21, %c0_22] : memref<128x64xf32, #tpu.memory_space<vmem>>, vector<128x64xf32>
    %cst_23 = arith.constant dense<0.000000e+00> : vector<2x64xf32>
    %26 = tpu.matmul %24, %25, %cst_23 {dimension_numbers = #tpu.dot_dimension_numbers<[1], [0], [0], [1], [0, 0, 1, 1], [], []>} : vector<2x128xf32>, vector<128x64xf32>, vector<2x64xf32> -> vector<2x64xf32>
    %c0_24 = arith.constant 0 : index
    %c0_25 = arith.constant 0 : index
    %27 = vector.load %arg10[%c0_24, %c0_25] : memref<1x64xf32, #tpu.memory_space<vmem>>, vector<1x64xf32>
    %28 = vector.broadcast %27 : vector<1x64xf32> to vector<2x64xf32>
    %29 = arith.addf %26, %28 : vector<2x64xf32>
    %cst_26 = arith.constant 0.000000e+00 : f32
    %30 = vector.broadcast %cst_26 : f32 to vector<2x64xf32>
    %31 = arith.maximumf %29, %30 : vector<2x64xf32>
    %c0_27 = arith.constant 0 : index
    %c0_28 = arith.constant 0 : index
    %32 = vector.load %arg11[%c0_27, %c0_28] : memref<64x64xf32, #tpu.memory_space<vmem>>, vector<64x64xf32>
    %cst_29 = arith.constant dense<0.000000e+00> : vector<2x64xf32>
    %33 = tpu.matmul %17, %32, %cst_29 {dimension_numbers = #tpu.dot_dimension_numbers<[1], [0], [0], [1], [0, 0, 1, 1], [], []>} : vector<2x64xf32>, vector<64x64xf32>, vector<2x64xf32> -> vector<2x64xf32>
    %34 = arith.addf %31, %33 : vector<2x64xf32>
    %c0_30 = arith.constant 0 : index
    %c0_31 = arith.constant 0 : index
    %35 = vector.load %arg12[%c0_30, %c0_31] : memref<2x64xf32, #tpu.memory_space<vmem>>, vector<2x64xf32>
    tpu.vector_store %arg12[%c0_30, %c0_31], %34 {strides = array<i32>} : memref<2x64xf32, #tpu.memory_space<vmem>>, vector<2x64xf32>,
    return
  }
  func.func @transform_0(%arg0: i32) -> (i32, i32) {
    %c0_i32 = arith.constant 0 : i32
    %c0_i32_0 = arith.constant 0 : i32
    return %arg0, %c0_i32 : i32, i32
  }
  func.func @transform_1(%arg0: i32) -> (i32, i32) {
    %c0_i32 = arith.constant 0 : i32
    %c0_i32_0 = arith.constant 0 : i32
    %c0_i32_1 = arith.constant 0 : i32
    return %c0_i32, %c0_i32_0 : i32, i32
  }
  func.func @transform_2(%arg0: i32) -> (i32, i32) {
    %c0_i32 = arith.constant 0 : i32
    %c0_i32_0 = arith.constant 0 : i32
    %c0_i32_1 = arith.constant 0 : i32
    return %c0_i32, %c0_i32_0 : i32, i32
  }
  func.func @transform_3(%arg0: i32) -> (i32, i32) {
    %c0_i32 = arith.constant 0 : i32
    %c0_i32_0 = arith.constant 0 : i32
    %c0_i32_1 = arith.constant 0 : i32
    return %c0_i32, %c0_i32_0 : i32, i32
  }
  func.func @transform_4(%arg0: i32) -> (i32, i32) {
    %c0_i32 = arith.constant 0 : i32
    %c0_i32_0 = arith.constant 0 : i32
    %c0_i32_1 = arith.constant 0 : i32
    return %c0_i32, %c0_i32_0 : i32, i32
  }
  func.func @transform_5(%arg0: i32) -> (i32, i32) {
    %c0_i32 = arith.constant 0 : i32
    %c0_i32_0 = arith.constant 0 : i32
    %c0_i32_1 = arith.constant 0 : i32
    return %c0_i32, %c0_i32_0 : i32, i32
  }
  func.func @transform_6(%arg0: i32) -> (i32, i32) {
    %c0_i32 = arith.constant 0 : i32
    %c0_i32_0 = arith.constant 0 : i32
    %c0_i32_1 = arith.constant 0 : i32
    return %c0_i32, %c0_i32_0 : i32, i32
  }
  func.func @transform_7(%arg0: i32) -> (i32, i32) {
    %c0_i32 = arith.constant 0 : i32
    %c0_i32_0 = arith.constant 0 : i32
    %c0_i32_1 = arith.constant 0 : i32
    return %c0_i32, %c0_i32_0 : i32, i32
  }
  func.func @transform_8(%arg0: i32) -> (i32, i32) {
    %c0_i32 = arith.constant 0 : i32
    %c0_i32_0 = arith.constant 0 : i32
    %c0_i32_1 = arith.constant 0 : i32
    return %c0_i32, %c0_i32_0 : i32, i32
  }
  func.func @transform_9(%arg0: i32) -> (i32, i32) {
    %c0_i32 = arith.constant 0 : i32
    %c0_i32_0 = arith.constant 0 : i32
    %c0_i32_1 = arith.constant 0 : i32
    return %c0_i32, %c0_i32_0 : i32, i32
  }
  func.func @transform_10(%arg0: i32) -> (i32, i32) {
    %c0_i32 = arith.constant 0 : i32
    %c0_i32_0 = arith.constant 0 : i32
    %c0_i32_1 = arith.constant 0 : i32
    return %c0_i32, %c0_i32_0 : i32, i32
  }
  func.func @transform_11(%arg0: i32) -> (i32, i32) {
    %c0_i32 = arith.constant 0 : i32
    %c0_i32_0 = arith.constant 0 : i32
    return %arg0, %c0_i32 : i32, i32
  }
}

</mosaic_0001>

<bundles_post_ra>
// kernel: tpu_custom_call.1
= control target key start
LH: loop header
LB: loop body
LE: loop exit
PB: predicated region body
PF: predicated region fallthrough
CT: control target
= control target key end

     0   :  { %v929_v3 = vmov 0.0|0.0   ;;  %vm930_vm0 = vmmov 0   ;;  %v931_v6 = vmov 0.0   ;;  %s1260_s0 = inlined_call_operand.vmem [shape: f32[2,64], index: 0, kind: input, shape index: {}]   ;;  %s1261_s1 = inlined_call_operand.vmem [shape: f32[64,128], index: 1, kind: input, shape index: {}]   ;;  %s1262_s2 = inlined_call_operand.vmem [shape: f32[1,128], index: 2, kind: input, shape index: {}]   ;;  %s1263_s3 = inlined_call_operand.vmem [shape: f32[128,64], index: 3, kind: input, shape index: {}]   ;;  %s1264_s4 = inlined_call_operand.vmem [shape: f32[1,64], index: 4, kind: input, shape index: {}]   ;;  %s1265_s5 = inlined_call_operand.vmem [shape: f32[64,64], index: 5, kind: input, shape index: {}]   ;;  %s1266_s6 = inlined_call_operand.vmem [shape: f32[64,128], index: 6, kind: input, shape index: {}]   ;;  %s1267_s7 = inlined_call_operand.vmem [shape: f32[1,128], index: 7, kind: input, shape index: {}]   ;;  %s1268_s8 = inlined_call_operand.vmem [shape: f32[128,64], index: 8, kind: input, shape index: {}]   ;;  %s1269_s9 = inlined_call_operand.vmem [shape: f32[1,64], index: 9, kind: input, shape index: {}]   ;;  %s1270_s10 = inlined_call_operand.vmem [shape: f32[64,64], index: 10, kind: input, shape index: {}]   ;;  %s1271_s11 = inlined_call_operand.hbm [shape: f32[2,64], index: 11, kind: output, shape index: {}]  }
   0x1   :  { %v40_v0 = vld [vmem:[%s1261_s1] sm:$0xff]  ;;  %v41_v1 = vld [vmem:[%s1261_s1 + $0x8] sm:$0xff]  ;;  %v42_v2 = vld [vmem:[%s1261_s1 + $0x10] sm:$0xff]  ;;  %805 = vmatprep.subr.bf16.mxu0 %v929_v3  ;;  %675 = vmatprep.mubr.msk.f32.mxu0 %vm930_vm0, %v931_v6 }
   0x2   :  { %v806_v4 = vpack.c.bf16 %v41_v1, %v40_v0  ;;  %v43_v5 = vld [vmem:[%s1261_s1 + $0x18] sm:$0xff]  ;;  %817 = vmatprep.subr.bf16.mxu1 %v929_v3  ;;  %710 = vmatprep.mubr.msk.f32.mxu1 %vm930_vm0, %v931_v6  ;;  %v130_v8 = vld [vmem:[%s1263_s3] sm:$0xff]  ;;  %v131_v9 = vld [vmem:[%s1263_s3 + $0x8] sm:$0xff] }
   0x3   :  { %v809_v7 = vpack.c.bf16 %v43_v5, %v42_v2  ;;  %v132_v10 = vld [vmem:[%s1263_s3 + $0x10] sm:$0xff]  ;;  %v44_v11 = vld [vmem:[%s1261_s1 + $0x20] sm:$0xff]  ;;  %v45_v12 = vld [vmem:[%s1261_s1 + $0x28] sm:$0xff]  ;;  %v818_v13 = vpack.c.bf16 %v131_v9, %v130_v8 }
   0x4   :  { %807 = vmatpush3.bf16.msra.mxu0 %v806_v4  ;;  %v133_v14 = vld [vmem:[%s1263_s3 + $0x18] sm:$0xff]  ;;  %v812_v16 = vpack.c.bf16 %v45_v12, %v44_v11  ;;  %v134_v17 = vld [vmem:[%s1263_s3 + $0x20] sm:$0xff]  ;;  %v135_v18 = vld [vmem:[%s1263_s3 + $0x28] sm:$0xff] }
   0x5   :  { %808 = vmatprep.subr.bf16.mxu0 %v929_v3  ;;  %819 = vmatpush3.bf16.msra.mxu1 %v818_v13  ;;  %v821_v15 = vpack.c.bf16 %v133_v14, %v132_v10  ;;  %v46_v19 = vld [vmem:[%s1261_s1 + $0x30] sm:$0xff]  ;;  %v47_v20 = vld [vmem:[%s1261_s1 + $0x38] sm:$0xff] }
   0x6   :  { %820 = vmatprep.subr.bf16.mxu1 %v929_v3 }
   0x8   :  { %810 = vmatpush3.bf16.msra.mxu0 %v809_v7 }
   0x9   :  { %811 = vmatprep.subr.bf16.mxu0 %v929_v3 }
   0xa   :  { %16 = vsyncpa [#allocation3], 0  ;;  %822 = vmatpush3.bf16.msra.mxu1 %v821_v15  ;;  %v824_v21 = vpack.c.bf16 %v135_v18, %v134_v17  ;;  %v815_v22 = vpack.c.bf16 %v47_v20, %v46_v19  ;;  %v136_v23 = vld [vmem:[%s1263_s3 + $0x30] sm:$0xff]  ;;  %v137_v24 = vld [vmem:[%s1263_s3 + $0x38] sm:$0xff]  ;;  %vm55_vm1 = vcmask 523264   ;;  %vm565_vm2 = vcmask 517120  }
   0xb   :  { %823 = vmatprep.subr.bf16.mxu1 %v929_v3  ;;  %v224_v25 = vld [vmem:[%s1265_s5] sm:$0xff]  ;;  %v225_v26 = vld [vmem:[%s1265_s5 + $0x8] sm:$0xff]  ;;  %v827_v27 = vpack.c.bf16 %v137_v24, %v136_v23  ;;  %v226_v32 = vld [vmem:[%s1265_s5 + $0x10] sm:$0xff] }
   0xc   :  { %813 = vmatpush3.bf16.msra.mxu0 %v812_v16  ;;  %v39_v28 = vld [vmem:[%s1260_s0] sm:$0x3]  ;;  %v139_v30 = vld [vmem:[%s1263_s3 + $0x48] sm:$0xff]  ;;  %v842_v31 = vpack.c.bf16 %v225_v26, %v224_v25  ;;  %v227_v33 = vld [vmem:[%s1265_s5 + $0x18] sm:$0xff] }
   0xd   :  { %814 = vmatprep.subr.bf16.mxu0 %v929_v3  ;;  %v138_v29 = vld [vmem:[%s1263_s3 + $0x40] sm:$0xff]  ;;  %v140_v35 = vld [vmem:[%s1263_s3 + $0x50] sm:$0xff]  ;;  %v141_v36 = vld [vmem:[%s1263_s3 + $0x58] sm:$0xff]  ;;  %v845_v37 = vpack.c.bf16 %v227_v33, %v226_v32 }
   0xe   :  { %825 = vmatpush3.bf16.msra.mxu1 %v824_v21  ;;  %v830_v34 = vpack.c.bf16 %v139_v30, %v138_v29  ;;  %v833_v38 = vpack.c.bf16 %v141_v36, %v140_v35  ;;  %v142_v39 = vld [vmem:[%s1263_s3 + $0x60] sm:$0xff]  ;;  %v143_v40 = vld [vmem:[%s1263_s3 + $0x68] sm:$0xff]  ;;  %v144_v45 = vld [vmem:[%s1263_s3 + $0x70] sm:$0xff] }
   0xf   :  { %826 = vmatprep.subr.bf16.mxu1 %v929_v3  ;;  %v836_v41 = vpack.c.bf16 %v143_v40, %v142_v39  ;;  %v228_v42 = vld [vmem:[%s1265_s5 + $0x20] sm:$0xff]  ;;  %v229_v43 = vld [vmem:[%s1265_s5 + $0x28] sm:$0xff]  ;;  %v145_v46 = vld [vmem:[%s1263_s3 + $0x78] sm:$0xff] }
  0x10   :  { %816 = vmatpush3.bf16.msra.mxu0 %v815_v22  ;;  %v848_v44 = vpack.c.bf16 %v229_v43, %v228_v42  ;;  %v839_v47 = vpack.c.bf16 %v145_v46, %v144_v45  ;;  %v230_v48 = vld [vmem:[%s1265_s5 + $0x30] sm:$0xff]  ;;  %v231_v49 = vld [vmem:[%s1265_s5 + $0x38] sm:$0xff]  ;;  %v303_v51 = vld [vmem:[%s1266_s6] sm:$0xff] }
  0x11   :  { %841 = vmatprep.subr.bf16.mxu0 %v929_v3  ;;  %v851_v50 = vpack.c.bf16 %v231_v49, %v230_v48  ;;  %v304_v52 = vld [vmem:[%s1266_s6 + $0x8] sm:$0xff]  ;;  %v305_v54 = vld [vmem:[%s1266_s6 + $0x10] sm:$0xff]  ;;  %v306_v55 = vld [vmem:[%s1266_s6 + $0x18] sm:$0xff] }
  0x12   :  { %828 = vmatpush3.bf16.msra.mxu1 %v827_v27  ;;  %v854_v53 = vpack.c.bf16 %v304_v52, %v303_v51  ;;  %v857_v56 = vpack.c.bf16 %v306_v55, %v305_v54  ;;  %v307_v57 = vld [vmem:[%s1266_s6 + $0x20] sm:$0xff]  ;;  %v308_v58 = vld [vmem:[%s1266_s6 + $0x28] sm:$0xff]  ;;  %v309_v1 = vld [vmem:[%s1266_s6 + $0x30] sm:$0xff] }
  0x13   :  { %676 = vmatmul.mubr.msk.f32.vlgmr.msra.gmra.mrb[0].mxu0 %vm55_vm1, %v39_v28  ;;  %829 = vmatprep.subr.bf16.mxu1 %v929_v3  ;;  %v860_v59 = vpack.c.bf16 %v308_v58, %v307_v57  ;;  %v581_v60 = vld [vmem:[%s1262_s2] ss:$0 sm:$0xff]  ;;  %v310_v2 = vld [vmem:[%s1266_s6 + $0x38] sm:$0xff]  ;;  %v393_v9 = vld [vmem:[%s1268_s8 + $0x8] sm:$0xff] }
  0x14   :  { %843 = vmatpush3.bf16.msra.mxu0 %v842_v31  ;;  %729 = vmatprep.mubr.msk.f32.mxu0 %vm930_vm0, %v931_v6  ;;  %v863_v4 = vpack.c.bf16 %v310_v2, %v309_v1  ;;  %v392_v8 = vld [vmem:[%s1268_s8] sm:$0xff]  ;;  %v394_v10 = vld [vmem:[%s1268_s8 + $0x10] sm:$0xff]  ;;  %v395_v12 = vld [vmem:[%s1268_s8 + $0x18] sm:$0xff] }
  0x15   :  { %844 = vmatprep.subr.bf16.mxu0 %v929_v3  ;;  %v866_v11 = vpack.c.bf16 %v393_v9, %v392_v8  ;;  %v869_v13 = vpack.c.bf16 %v395_v12, %v394_v10  ;;  %v396_v14 = vld [vmem:[%s1268_s8 + $0x20] sm:$0xff]  ;;  %v397_v15 = vld [vmem:[%s1268_s8 + $0x28] sm:$0xff]  ;;  %v398_v17 = vld [vmem:[%s1268_s8 + $0x30] sm:$0xff] }
  0x16   :  { %831 = vmatpush3.bf16.msra.mxu1 %v830_v34  ;;  %v872_v16 = vpack.c.bf16 %v397_v15, %v396_v14  ;;  %v399_v18 = vld [vmem:[%s1268_s8 + $0x38] sm:$0xff]  ;;  %v400_v20 = vld [vmem:[%s1268_s8 + $0x40] sm:$0xff]  ;;  %v401_v21 = vld [vmem:[%s1268_s8 + $0x48] sm:$0xff] }
  0x17   :  { %832 = vmatprep.subr.bf16.mxu1 %v929_v3  ;;  %v875_v19 = vpack.c.bf16 %v399_v18, %v398_v17  ;;  %v878_v22 = vpack.c.bf16 %v401_v21, %v400_v20  ;;  %v402_v23 = vld [vmem:[%s1268_s8 + $0x50] sm:$0xff]  ;;  %v403_v24 = vld [vmem:[%s1268_s8 + $0x58] sm:$0xff]  ;;  %v404_v26 = vld [vmem:[%s1268_s8 + $0x60] sm:$0xff] }
  0x18   :  { %846 = vmatpush3.bf16.msra.mxu0 %v845_v37  ;;  %v881_v25 = vpack.c.bf16 %v403_v24, %v402_v23  ;;  %v405_v27 = vld [vmem:[%s1268_s8 + $0x68] sm:$0xff]  ;;  %v583_v29 = vld [vmem:[%s1264_s4] ss:$0 sm:$0xff]  ;;  %v489_v39 = vld [vmem:[%s1270_s10 + $0x18] sm:$0xff] }
  0x19   :  { %847 = vmatprep.subr.bf16.mxu0 %v929_v3  ;;  %v486_v33 = vld [vmem:[%s1270_s10] sm:$0xff]  ;;  %v487_v34 = vld [vmem:[%s1270_s10 + $0x8] sm:$0xff]  ;;  %v406_v46 = vld [vmem:[%s1268_s8 + $0x70] sm:$0xff] }
  0x1a   :  { %834 = vmatpush3.bf16.msra.mxu1 %v833_v38  ;;  %v890_v36 = vpack.c.bf16 %v487_v34, %v486_v33  ;;  %v488_v38 = vld [vmem:[%s1270_s10 + $0x10] sm:$0xff]  ;;  %v491_v42 = vld [vmem:[%s1270_s10 + $0x28] sm:$0xff]  ;;  %v585_v49 = vld [vmem:[%s1267_s7] ss:$0 sm:$0xff] }
  0x1b   :  { %835 = vmatprep.subr.bf16.mxu1 %v929_v3  ;;  %v893_v40 = vpack.c.bf16 %v489_v39, %v488_v38  ;;  %v587_v55 = vld [vmem:[%s1269_s9] ss:$0 sm:$0xff] }
  0x1c   :  { %849 = vmatpush3.bf16.msra.mxu0 %v848_v44  ;;  %v492_v44 = vld [vmem:[%s1270_s10 + $0x30] sm:$0xff] }
  0x1d   :  { %850 = vmatprep.subr.bf16.mxu0 %v929_v3 }
  0x1e   :  { %837 = vmatpush3.bf16.msra.mxu1 %v836_v41  ;;  %v490_v41 = vld [vmem:[%s1270_s10 + $0x20] sm:$0xff] }
  0x1f   :  { %838 = vmatprep.subr.bf16.mxu1 %v929_v3  ;;  %v896_v43 = vpack.c.bf16 %v491_v42, %v490_v41 }
  0x20   :  { %852 = vmatpush3.bf16.msra.mxu0 %v851_v50 }
  0x21   :  { %853 = vmatprep.subr.bf16.mxu0 %v929_v3 }
  0x22   :  { %840 = vmatpush3.bf16.msra.mxu1 %v839_v47  ;;  %v407_v47 = vld [vmem:[%s1268_s8 + $0x78] sm:$0xff]  ;;  %s932_s8 = smov [#allocation2]  }
  0x23   :  { %865 = vmatprep.subr.bf16.mxu1 %v929_v3  ;;  %730 = vmatmul.mubr.msk.f32.vlgmr.msra.gmra.mrb[2].mxu0 %vm55_vm1, %v39_v28  ;;  %v884_v28 = vpack.c.bf16 %v405_v27, %v404_v26  ;;  %v887_v48 = vpack.c.bf16 %v407_v47, %v406_v46  ;;  %s573_s19 = sshll.u32 %s932_s8, 4  ;;  %s574_s19 = int_to_ptr.vmem [resolvable:$true] %s573_s19 }
  0x24   :  { %855 = vmatpush3.bf16.msra.mxu0 %v854_v53  ;;  %748 = vmatprep.mubr.msk.f32.mxu0 %vm930_vm0, %v931_v6  ;;  %s905_s7 = scalar_lea.vmem %s574_s19, 32  ;;  %p910_p1 = scmp.lt.s32.totalorder %s574_s19, %s574_s19 }
  0x25   :  { %856 = vmatprep.subr.bf16.mxu0 %v929_v3  ;;  %p906_p0 = scmp.ne.s32.totalorder %s574_s19, %s905_s7  ;;  %p911_p2 = scmp.lt.s32.totalorder %s905_s7, %s905_s7 }
  0x27   :  { %p912_p3 = por %p911_p2, %p910_p1 }
  0x28   :  { %858 = vmatpush3.bf16.msra.mxu0 %v857_v56 }
  0x29   :  { %859 = vmatprep.subr.bf16.mxu0 %v929_v3  ;;  %p913_p4 = pnand %p912_p3, %p906_p0 }
  0x2c   :  { %861 = vmatpush3.bf16.msra.mxu0 %v860_v59 }
  0x2d   :  { %862 = vmatprep.subr.bf16.mxu0 %v929_v3 }
  0x30   :  { %864 = vmatpush3.bf16.msra.mxu0 %v863_v4 }
  0x31   :  { %889 = vmatprep.subr.bf16.mxu0 %v929_v3 }
  0xe6   :  { %v125_v61 = vpop.f32.mrb[0].mxu0 }
  0xe7   :  { %v126_v62 = vadd.f32 %v581_v60, %v125_v61  ;;  %v677_v63 = vpop.f32.mrb[1].mxu0 }
  0xe9   :  { %v129_v0 = vmax.f32 %v126_v62, 0.0 }
  0xeb   :  { %711 = vmatmul.mubr.f32.vlgmr.msra.gmra.mrb[0].mxu1 %v129_v0 }
  0xec   :  { %783 = vmatprep.mubr.msk.f32.mxu1 %vm930_vm0, %v931_v6  ;;  %867 = vmatpush3.bf16.msra.mxu1 %v866_v11 }
  0xed   :  { %868 = vmatprep.subr.bf16.mxu1 %v929_v3 }
  0xf0   :  { %870 = vmatpush3.bf16.msra.mxu1 %v869_v13 }
  0xf1   :  { %871 = vmatprep.subr.bf16.mxu1 %v929_v3 }
  0xf4   :  { %873 = vmatpush3.bf16.msra.mxu1 %v872_v16 }
  0xf5   :  { %874 = vmatprep.subr.bf16.mxu1 %v929_v3 }
  0xf6   :  { %v298_v5 = vpop.f32.mrb[2].mxu0 }
  0xf7   :  { %v731_v7 = vpop.f32.mrb[3].mxu0 }
  0xf8   :  { %876 = vmatpush3.bf16.msra.mxu1 %v875_v19 }
  0xf9   :  { %877 = vmatprep.subr.bf16.mxu1 %v929_v3 }
  0xfc   :  { %879 = vmatpush3.bf16.msra.mxu1 %v878_v22 }
  0xfd   :  { %880 = vmatprep.subr.bf16.mxu1 %v929_v3 }
 0x100   :  { %882 = vmatpush3.bf16.msra.mxu1 %v881_v25 }
 0x101   :  { %883 = vmatprep.subr.bf16.mxu1 %v929_v3 }
 0x104   :  { %885 = vmatpush3.bf16.msra.mxu1 %v884_v28 }
 0x105   :  { %886 = vmatprep.subr.bf16.mxu1 %v929_v3 }
 0x108   :  { %888 = vmatpush3.bf16.msra.mxu1 %v887_v48 }
 0x1be   :  { %v219_v30 = vpop.f32.mrb[0].mxu1 }
 0x1bf   :  { %v220_v31 = vadd.f32 %v583_v29, %v219_v30  ;;  %v712_v32 = vpop.f32.mrb[1].mxu1 }
 0x1c1   :  { %v223_v35 = vmax.f32 %v220_v31, 0.0 }
 0x1c3   :  { %v302_v37 = vadd.f32 %v298_v5, %v223_v35 }
 0x1c5   :  { %749 = vmatmul.mubr.msk.f32.vlgmr.msra.gmra.mrb[4].mxu0 %vm55_vm1, %v302_v37 }
 0x1c6   :  { %891 = vmatpush3.bf16.msra.mxu0 %v890_v36  ;;  %802 = vmatprep.mubr.msk.f32.mxu0 %vm930_vm0, %v931_v6  ;;  %v493_v6 = vld [vmem:[%s1270_s10 + $0x38] sm:$0xff] }
 0x1c7   :  { %892 = vmatprep.subr.bf16.mxu0 %v929_v3  ;;  %v899_v45 = vpack.c.bf16 %v493_v6, %v492_v44 }
 0x1ca   :  { %894 = vmatpush3.bf16.msra.mxu0 %v893_v40 }
 0x1cb   :  { %895 = vmatprep.subr.bf16.mxu0 %v929_v3 }
 0x1ce   :  { %897 = vmatpush3.bf16.msra.mxu0 %v896_v43 }
 0x1cf   :  { %898 = vmatprep.subr.bf16.mxu0 %v929_v3 }
 0x1d2   :  { %900 = vmatpush3.bf16.msra.mxu0 %v899_v45 }
 0x1d5   :  { %803 = vmatmul.mubr.msk.f32.vlgmr.msra.gmra.mrb[6].mxu0 %vm55_vm1, %v302_v37 }
 0x298   :  { %v387_v50 = vpop.f32.mrb[4].mxu0 }
 0x299   :  { %v388_v51 = vadd.f32 %v585_v49, %v387_v50  ;;  %v750_v3 = vpop.f32.mrb[5].mxu0 }
 0x29b   :  { %v391_v52 = vmax.f32 %v388_v51, 0.0 }
 0x29d   :  { %784 = vmatmul.mubr.f32.vlgmr.msra.gmra.mrb[2].mxu1 %v391_v52 }
 0x2a8   :  { %v560_v53 = vpop.f32.mrb[6].mxu0 }
 0x2a9   :  { %v804_v54 = vpop.f32.mrb[7].mxu0 }
 0x370   :  { %v481_v56 = vpop.f32.mrb[2].mxu1 }
 0x371   :  { %v482_v57 = vadd.f32 %v587_v55, %v481_v56  ;;  %v785_v58 = vpop.f32.mrb[3].mxu1 }
 0x373   :  { %v485_v59 = vmax.f32 %v482_v57, 0.0 }
 0x375   :  { %v564_v60 = vadd.f32 %v560_v53, %v485_v59 }
 0x377   :  { %566 = vst.msk [vmem:[#allocation2] sm:$0x3] %vm565_vm2, %v564_v60 }
 0x378   :  { %916 = shalt.err (!%p913_p4)
}
 0x379   :  { %s917_s9 = scalar_lea.hbm %s1271_s11, 32 }
 0x37a   :  { %p918_p5 = scmp.ne.s32.totalorder %s1271_s11, %s917_s9  ;;  %p921_p6 = scmp.lt.u32.totalorder %s917_s9, %s1271_s11 }
 0x37c   :  { %p923_p7 = pnand %p921_p6, %p918_p5 }
 0x37e   :  { %926 = shalt.err (!%p923_p7)
}
 0x37f   :  { %576 = dma.vmem_to_hbm [thread:$0]  %s574_s19, 32, %s1271_s11, [#allocation3]  }
 0x380   :  { %927 = dma.done.wait [#allocation3], 32  }
 0x381   :  { %928 = vsyncadd [#allocation3], 4294967264 }
 0x382   :  { %580 = vsyncpa [#allocation3], 1 }

</bundles_post_ra>
